<compile_context>
chip_gen: v6e
topology: v6e:2x2x1
jax: 0.10.0
libtpu: 0.0.40
codegen_flags: <defaults>
</compile_context>

<pallas_src>
import functools

import numpy as np

import jax
import jax.numpy as jnp
from jax.experimental import pallas as pl
from jax.experimental.pallas import tpu as pltpu


def _round_up(a, b):
    return -(-a // b) * b


def _bf16_fast_path_available():
    """bf16 VPU/EUP exists on v6e/v7x; on v5e and older bf16 is pure overhead."""
    try:
        kind = jax.devices()[0].device_kind.lower()
    except Exception:
        return False
    return ("v6" in kind) or ("v7" in kind)


def _choose_tiling(n, max_tile):
    # Grid length even and >= 2 so both v7x TensorCores get (balanced) work;
    # on v5e/v6e the one extra grid step is noise.  Tiles are multiples of 128
    # (lane-dense stores); max_tile is bounded by vreg pressure of the
    # [32, tile_n] activation, not VMEM.
    grid = max(2, pl.cdiv(n, max_tile))
    if grid % 2:
        grid += 1
    tile = max(128, _round_up(pl.cdiv(n, grid), 128))
    return tile, grid, tile * grid


def _pack_params(weights, biases, compute_dtype):
    """Pack all layers into one weight buffer + one bias buffer.

    Layer l occupies rows [off_l, off_l + d_out_l) (off_l aligned to 8) of
      w_buf: [total_rows, max_in]  in compute_dtype
      b_buf: [total_rows, 1]       in f32
    Returns (w_buf, b_buf, arch) with arch = ((off, d_out, d_in), ...).
    """
    douts = [int(w.shape[0]) for w in weights]
    dins = [int(w.shape[1]) for w in weights]
    seg_rows = [_round_up(d, 8) for d in douts]
    offsets = [0]
    for s in seg_rows[:-1]:
        offsets.append(offsets[-1] + s)
    total_rows = sum(seg_rows)
    max_in = max(dins)

    w_buf = jnp.zeros((total_rows, max_in), compute_dtype)
    b_buf = jnp.zeros((total_rows, 1), jnp.float32)
    for off, w, b in zip(offsets, weights, biases):
        w_buf = w_buf.at[off:off + w.shape[0], :w.shape[1]].set(
            w.astype(compute_dtype))
        b_buf = b_buf.at[off:off + b.shape[0], 0].set(b.astype(jnp.float32))

    arch = tuple((o, do, di) for o, do, di in zip(offsets, douts, dins))
    return w_buf, b_buf, arch


def _mlp_kernel(arch, use_bf16, x_ref, w_ref, b_ref, out_ref):
    """Feature-major MLP tile: activations are [width, tile_n] (batch on lanes)."""
    num_layers = len(arch)
    x = x_ref[...]                                        # [d_in0, tile_n] f32
    h = x
    for l, (off, dout, din) in enumerate(arch):
        b = b_ref[off:off + dout, 0:1]                    # [dout, 1] f32, resident
        if l == 0 and din <= 8:
            # Tiny K (2 for (x,t) PINNs): broadcast FMAs on the VPU instead of
            # an MXU matmul that pads K to the systolic depth.
            acc = w_ref[off:off + dout, 0:1].astype(jnp.float32) * x[0:1, :]
            for j in range(1, din):
                acc = acc + (w_ref[off:off + dout, j:j + 1].astype(jnp.float32)
                             * x[j:j + 1, :])
            h = acc + b
        else:
            w = w_ref[off:off + dout, 0:din]              # pre-cast on host
            h = jnp.dot(w, h.astype(w.dtype),
                        preferred_element_type=jnp.float32) + b
        if l < num_layers - 1:
            if use_bf16:
                # bf16 tanh halves EUP pushes on v6e/v7x and feeds the next
                # MXU dot directly in bf16 (f32 accumulation preserved above).
                h = jnp.tanh(h.astype(jnp.bfloat16))
            else:
                h = jnp.tanh(h)
    out_ref[...] = h.astype(out_ref.dtype)


def dnn_forward(x, lb, ub, weights, biases, *, tile_n=None,
                compute_dtype=jnp.float32):
    """Forward pass of the DNN with a single Pallas TPU kernel.

    x:       [N, layers[0]]  float32
    lb, ub:  [layers[0]]     float32
    weights: list of torch-form [layers[i+1], layers[i]] float32
    biases:  list of [layers[i+1]] float32
    compute_dtype: jnp.float32 (default, all chips) or jnp.bfloat16
                   (used only on v6e/v7x; silently falls back to f32 on v5e
                   and older, where there is no bf16 VPU/EUP).
    """
    n, d_in = x.shape
    d_out = int(weights[-1].shape[0])

    compute_dtype = np.dtype(compute_dtype)
    if compute_dtype == np.dtype(jnp.bfloat16) and not _bf16_fast_path_available():
        compute_dtype = np.dtype(jnp.float32)
    use_bf16 = compute_dtype == np.dtype(jnp.bfloat16)

    lb = jnp.asarray(lb, jnp.float32)
    ub = jnp.asarray(ub, jnp.float32)

    # --- fold normalization  x_n = s * x + t  into the first layer ----------
    # NOTE: if any ub[i] == lb[i] this produces inf/nan (same hazard as the
    # PyTorch reference), now baked into the folded layer-0 weights.
    s = 2.0 / (ub - lb)                    # [d_in]
    t = -2.0 * lb / (ub - lb) - 1.0        # [d_in]
    w0 = weights[0] * s[None, :]
    b0 = biases[0] + weights[0] @ t
    ws = [w0] + list(weights[1:])
    bs = [b0] + list(biases[1:])

    w_buf, b_buf, arch = _pack_params(ws, bs, compute_dtype)

    # --- batch tiling --------------------------------------------------------
    if tile_n is None:
        max_tile = 2048 if use_bf16 else 1024
        tile_n, grid_n, n_pad = _choose_tiling(n, max_tile)
    else:
        grid_n = pl.cdiv(n, tile_n)
        n_pad = grid_n * tile_n

    # Single relayout pass: pad the batch, then flip to feature-major so the
    # batch sits on the 128-lane axis.  (The pad fuses into the transpose.)
    xp = x.astype(jnp.float32)
    if n_pad != n:
        xp = jnp.pad(xp, ((0, n_pad - n), (0, 0)))
    xt = xp.T                              # [d_in, n_pad]

    flops = 2 * sum(di * do for (_, do, di) in arch) * n_pad
    transc = sum(do for (_, do, _) in arch[:-1]) * n_pad
    bytes_accessed = (4 * (d_in + d_out) * n_pad
                      + w_buf.size * w_buf.dtype.itemsize
                      + b_buf.size * 4)

    kernel = functools.partial(_mlp_kernel, arch, use_bf16)

    out_t = pl.pallas_call(
        kernel,
        out_shape=jax.ShapeDtypeStruct((d_out, n_pad), jnp.float32),
        grid=(grid_n,),
        in_specs=[
            pl.BlockSpec((d_in, tile_n), lambda i: (0, i)),   # x tile (lane-dense)
            pl.BlockSpec(w_buf.shape, lambda i: (0, 0)),      # packed weights, resident
            pl.BlockSpec(b_buf.shape, lambda i: (0, 0)),      # packed biases, resident
        ],
        out_specs=pl.BlockSpec((d_out, tile_n), lambda i: (0, i)),
        compiler_params=pltpu.CompilerParams(
            dimension_semantics=("parallel",),   # megacore-shardable batch axis
        ),
        cost_estimate=pl.CostEstimate(
            flops=int(flops),
            transcendentals=int(transc),
            bytes_accessed=int(bytes_accessed),
        ),
    )(xt, w_buf, b_buf)

    return out_t[:, :n].T                  # [1, N] slice + .T is a reshape


def init_params(layers, key):
    """Torch nn.Linear-style init; weights stored in torch [out, in] form."""
    weights, biases = [], []
    for i in range(len(layers) - 1):
        fan_in, fan_out = layers[i], layers[i + 1]
        key, kw, kb = jax.random.split(key, 3)
        bound = 1.0 / (fan_in ** 0.5)
        w = jax.random.uniform(kw, (fan_out, fan_in), jnp.float32, -bound, bound)
        b = jax.random.uniform(kb, (fan_out,), jnp.float32, -bound, bound)
        weights.append(w)
        biases.append(b)
    return weights, biases


def reference_forward(x, lb, ub, weights, biases):
    h = 2.0 * (x - lb) / (ub - lb) - 1.0
    for l, (w, b) in enumerate(zip(weights, biases)):
        h = h @ w.T + b
        if l < len(weights) - 1:
            h = jnp.tanh(h)
    return h


if __name__ == "__main__":
    # Typical PINN architecture: 2 inputs (x, t) -> 32 -> 32 -> 1 output.
    layers = [2, 32, 32, 1]
    batch = 1000          # not a multiple of the tile: exercises padding path

    key = jax.random.PRNGKey(0)
    key, kx = jax.random.split(key)

    lb = jnp.array([-1.0, 0.0], dtype=jnp.float32)
    ub = jnp.array([1.0, 1.0], dtype=jnp.float32)

    # Sample inputs inside the domain [lb, ub].
    u = jax.random.uniform(kx, (batch, layers[0]), jnp.float32)
    x = lb + (ub - lb) * u

    weights, biases = init_params(layers, key)
    ref = reference_forward(x, lb, ub, weights, biases)

    # f32 path (all chips): strict check.
    out = dnn_forward(x, lb, ub, weights, biases, compute_dtype=jnp.float32)
    out = jax.block_until_ready(out)
    assert out.shape == (batch, layers[-1])
    assert jnp.allclose(out, ref, atol=2e-5, rtol=1e-4), "f32 mismatch vs reference"

    # bf16 path smoke test (runs as bf16 only on v6e/v7x; auto-falls back to
    # f32 elsewhere).  Loose tolerance per bf16 rounding.
    out_bf16 = dnn_forward(x, lb, ub, weights, biases, compute_dtype=jnp.bfloat16)
    out_bf16 = jax.block_until_ready(out_bf16)
    assert out_bf16.shape == (batch, layers[-1])
    assert jnp.allclose(out_bf16, ref, atol=5e-2, rtol=5e-2), "bf16 mismatch vs reference"

    print("KERNEL_OK")
</pallas_src>

<mosaic_0001>
module attributes {stable_mosaic.version = 11 : i64} {
  func.func @_mlp_kernel(%arg0: i32, %arg1: memref<2x512xf32, #tpu.memory_space<vmem>>, %arg2: memref<72x32xf32, #tpu.memory_space<vmem>>, %arg3: memref<72x1xf32, #tpu.memory_space<vmem>>, %arg4: memref<1x512xf32, #tpu.memory_space<vmem>>) attributes {dimension_semantics = [#tpu.dimension_semantics<parallel>], iteration_bounds = array<i64: 2>, scalar_prefetch = 0 : i64, scratch_operands = 0 : i64, tpu.core_type = #tpu.core_type<tc>, window_params = [{transform_indices = @transform_0, window_bounds = array<i64: 2, 512>}, {pipeline_mode = #tpu.pipeline_mode<synchronous>, transform_indices = @transform_1, window_bounds = array<i64: 72, 32>}, {pipeline_mode = #tpu.pipeline_mode<synchronous>, transform_indices = @transform_2, window_bounds = array<i64: 72, 1>}, {transform_indices = @transform_3, window_bounds = array<i64: 1, 512>}]} {
    %c0 = arith.constant 0 : index
    %c0_0 = arith.constant 0 : index
    %0 = vector.load %arg1[%c0, %c0_0] : memref<2x512xf32, #tpu.memory_space<vmem>>, vector<2x512xf32>
    %c0_1 = arith.constant 0 : index
    %c0_2 = arith.constant 0 : index
    %1 = vector.load %arg3[%c0_1, %c0_2] : memref<72x1xf32, #tpu.memory_space<vmem>>, vector<32x1xf32>
    %c0_3 = arith.constant 0 : index
    %c0_4 = arith.constant 0 : index
    %2 = vector.load %arg2[%c0_3, %c0_4] : memref<72x32xf32, #tpu.memory_space<vmem>>, vector<32x1xf32>
    %3 = vector.extract_strided_slice %0 {offsets = [0, 0], sizes = [1, 512], strides = [1, 1]} : vector<2x512xf32> to vector<1x512xf32>
    %4 = vector.broadcast %2 : vector<32x1xf32> to vector<32x512xf32>
    %5 = vector.broadcast %3 : vector<1x512xf32> to vector<32x512xf32>
    %6 = arith.mulf %4, %5 : vector<32x512xf32>
    %c0_5 = arith.constant 0 : index
    %c1 = arith.constant 1 : index
    %7 = vector.load %arg2[%c0_5, %c1] : memref<72x32xf32, #tpu.memory_space<vmem>>, vector<32x1xf32>
    %8 = vector.extract_strided_slice %0 {offsets = [1, 0], sizes = [1, 512], strides = [1, 1]} : vector<2x512xf32> to vector<1x512xf32>
    %9 = vector.broadcast %7 : vector<32x1xf32> to vector<32x512xf32>
    %10 = vector.broadcast %8 : vector<1x512xf32> to vector<32x512xf32>
    %11 = arith.mulf %9, %10 : vector<32x512xf32>
    %12 = arith.addf %6, %11 : vector<32x512xf32>
    %13 = vector.broadcast %1 : vector<32x1xf32> to vector<32x512xf32>
    %14 = arith.addf %12, %13 : vector<32x512xf32>
    %15 = math.tanh %14 : vector<32x512xf32>
    %c32 = arith.constant 32 : index
    %c0_6 = arith.constant 0 : index
    %16 = vector.load %arg3[%c32, %c0_6] : memref<72x1xf32, #tpu.memory_space<vmem>>, vector<32x1xf32>
    %c32_7 = arith.constant 32 : index
    %c0_8 = arith.constant 0 : index
    %17 = vector.load %arg2[%c32_7, %c0_8] : memref<72x32xf32, #tpu.memory_space<vmem>>, vector<32x32xf32>
    %cst = arith.constant dense<0.000000e+00> : vector<32x512xf32>
    %18 = tpu.matmul %17, %15, %cst {dimension_numbers = #tpu.dot_dimension_numbers<[1], [0], [0], [1], [0, 0, 1, 1], [], []>} : vector<32x32xf32>, vector<32x512xf32>, vector<32x512xf32> -> vector<32x512xf32>
    %19 = vector.broadcast %16 : vector<32x1xf32> to vector<32x512xf32>
    %20 = arith.addf %18, %19 : vector<32x512xf32>
    %21 = math.tanh %20 : vector<32x512xf32>
    %c64 = arith.constant 64 : index
    %c0_9 = arith.constant 0 : index
    %22 = vector.load %arg3[%c64, %c0_9] : memref<72x1xf32, #tpu.memory_space<vmem>>, vector<1x1xf32>
    %c64_10 = arith.constant 64 : index
    %c0_11 = arith.constant 0 : index
    %23 = vector.load %arg2[%c64_10, %c0_11] : memref<72x32xf32, #tpu.memory_space<vmem>>, vector<1x32xf32>
    %cst_12 = arith.constant dense<0.000000e+00> : vector<1x512xf32>
    %24 = tpu.matmul %23, %21, %cst_12 {dimension_numbers = #tpu.dot_dimension_numbers<[1], [0], [0], [1], [0, 0, 1, 1], [], []>} : vector<1x32xf32>, vector<32x512xf32>, vector<1x512xf32> -> vector<1x512xf32>
    %25 = vector.broadcast %22 : vector<1x1xf32> to vector<1x512xf32>
    %26 = arith.addf %24, %25 : vector<1x512xf32>
    %c0_13 = arith.constant 0 : index
    %c0_14 = arith.constant 0 : index
    %27 = vector.load %arg4[%c0_13, %c0_14] : memref<1x512xf32, #tpu.memory_space<vmem>>, vector<1x512xf32>
    tpu.vector_store %arg4[%c0_13, %c0_14], %26 {strides = array<i32>} : memref<1x512xf32, #tpu.memory_space<vmem>>, vector<1x512xf32>,
    return
  }
  func.func @transform_0(%arg0: i32) -> (i32, i32) {
    %c0_i32 = arith.constant 0 : i32
    %c0_i32_0 = arith.constant 0 : i32
    return %c0_i32, %arg0 : i32, i32
  }
  func.func @transform_1(%arg0: i32) -> (i32, i32) {
    %c0_i32 = arith.constant 0 : i32
    %c0_i32_0 = arith.constant 0 : i32
    %c0_i32_1 = arith.constant 0 : i32
    return %c0_i32, %c0_i32_0 : i32, i32
  }
  func.func @transform_2(%arg0: i32) -> (i32, i32) {
    %c0_i32 = arith.constant 0 : i32
    %c0_i32_0 = arith.constant 0 : i32
    %c0_i32_1 = arith.constant 0 : i32
    return %c0_i32, %c0_i32_0 : i32, i32
  }
  func.func @transform_3(%arg0: i32) -> (i32, i32) {
    %c0_i32 = arith.constant 0 : i32
    %c0_i32_0 = arith.constant 0 : i32
    return %c0_i32, %arg0 : i32, i32
  }
}

</mosaic_0001>

<bundles_post_ra>
// kernel: tpu_custom_call.1
= control target key start
LH: loop header
LB: loop body
LE: loop exit
PB: predicated region body
PF: predicated region fallthrough
CT: control target
= control target key end

     0   :  { %8 = vsyncpa [#allocation3], 0  ;;  %s1300_s0 = inlined_call_operand.vmem [shape: f32[2,1024], index: 0, kind: input, shape index: {}]   ;;  %s1301_s1 = inlined_call_operand.vmem [shape: f32[72,32], index: 1, kind: input, shape index: {}]   ;;  %s1302_s2 = inlined_call_operand.vmem [shape: f32[72,1], index: 2, kind: input, shape index: {}]   ;;  %s1303_s3 = inlined_call_operand.hbm [shape: f32[1,1024], index: 3, kind: output, shape index: {}]  }
   0x1   :  { %10 = vsyncpa [#allocation3 + $0x1], 0  ;;  %s1109_s12 = smov 0   ;;  %s1111_s13 = smov 0  }
   0x2   :  { %s1113_s14 = smov 0   ;;  %s1115_s15 = smov 0  }
   0x3 LB: > { %s1130_s16 = sadd.s32 4294967295, %s1082_s15   ;;  %s885_s17 = sadd.s32 4294967294, %s1082_s15   ;;  %s1082_s15 = sphi %s1115_s15, %s1309_s15   ;;  %s1078_s14 = sphi %s1113_s14, %s1308_s14   ;;  %s1074_s13 = sphi %s1111_s13, %s1307_s13   ;;  %s1070_s12 = sphi %s1109_s12, %s1306_s12  }
   0x4   : > { %s1134_s18 = sadd.s32 1, %s1082_s15   ;;  %s91_s19 = sadd.s32 1, %s1078_s14 }
   0x5   : > { %s88_s20 = ssub.s32 %s1082_s15, %s1134_s18  ;;  %p101_p0 = scmp.ne.s32.totalorder %s1078_s14, %s1074_s13 }
   0x6   : > { %p89_p1 = scmp.eq.s32.totalorder %s88_s20, 0  ;;  %p102_p2 = scmp.eq.s32.totalorder %s1130_s16, 1 }
   0x7   : > { %p107_p3 = scmp.ne.s32.totalorder %s1074_s13, %s1070_s12  ;;  %p108_p4 = scmp.eq.s32.totalorder %s885_s17, 1 }
   0x8   : > { %s1145_s21 = scalar_select %p89_p1, %s1078_s14, %s91_s19  }
   0x9   : > { %p1147_p5 = por %p102_p2, %p101_p0  ;;  %p1151_p6 = por %p108_p4, %p107_p3 }
   0xa   : > { %p888_p7 = scmp.ge.s32.totalorder %s1082_s15, 1  ;;  %p141_p8 = scmp.lt.s32.totalorder %s1082_s15, 3 }
   0xc   : > { %p142_p9 = pnand %p888_p7, %p141_p8 }
   0xd   : > { %s890_s5 = sshll.u32 (!%p142_p9), %s1130_s16, 2  ;;  %s162_s29 = sand.u32 (!%p142_p9), 1, %s1074_s13  }
   0xe   : > { %145 = sbr.rel (%p142_p9) target bundleno = 643 (0x283), region = 32  ;;  %p166_p10 = scmp.lt.s32.totalorder (!%p142_p9), %s890_s5, 7 }
   0xf   : > { %s889_s30 = sshll.u32 (!%p142_p9), %s162_s29, 2  ;;  %s907_s4 = sshll.u32 (!%p142_p9), %s1130_s16, 6 }
  0x10   : > { %s812_s10 = scalar_lea.sflag (!%p142_p9), [#allocation3], %s162_s29  ;;  %s1088_s17 = smov (!%p142_p9), [#allocation2]  }
  0x11   : > { %s1026_s16 = sshll.u32 (!%p142_p9), %s1088_s17, 4  ;;  %s1027_s16 = int_to_ptr.vmem [resolvable:$false] %s1026_s16 }
  0x12   : > { %s1028_s19 = scalar_lea.vmem (!%p142_p9), %s1027_s16, 128 }
  0x13   : > { %v180_v0 = vld [vmem:[%s1301_s1 + $0x18] sm:$0xff]  ;;  %v179_v1 = vld [vmem:[%s1301_s1 + $0x10] sm:$0xff]  ;;  %v1084_v2 = vmov 1   ;;  %v1085_v3 = vmov 0   ;;  %v178_v4 = vld [vmem:[%s1301_s1 + $0x8] sm:$0xff]  ;;  %v1086_v15 = vmov 0.0   ;;  %v202_v16 = vlaneseq }
  0x14   : > { %951 = vset.pattern.permute.xlu0 %v1084_v2  ;;  %952 = vset.pattern.permute.xlu1 %v1085_v3  ;;  %v177_v5 = vld [vmem:[%s1301_s1] sm:$0xff]  ;;  %v176_v6 = vld [vmem:[%s1302_s2 + $0x18] sm:$0xff]  ;;  %v174_v7 = vld [vmem:[%s1302_s2 + $0x8] sm:$0xff]  ;;  %s1311_s5 = smov (!%p166_p10, %s890_s5), 7  ;;  %vm418_vm0 = vcmask 261120  }
  0x15   : > { %267 = vperm.xlu0 %951, %v180_v0   ;;  %193 = vperm.xlu1 %952, %v179_v1   ;;  %v393_v8 = vld [vmem:[%s1302_s2 + $0x38] sm:$0xff]  ;;  %v175_v9 = vld [vmem:[%s1302_s2 + $0x10] sm:$0xff]  ;;  %v391_v10 = vld [vmem:[%s1302_s2 + $0x28] sm:$0xff]  ;;  %s891_s6 = sshll.u32 %s1311_s5, 1  ;;  %v1200_v17 = vshrl.u32 %v202_v16, 7  ;;  %s164_s5 = scalar_lea.vmem [#allocation2], %s889_s30 }
  0x16   : > { %v173_v11 = vld [vmem:[%s1302_s2] sm:$0xff]  ;;  %v392_v13 = vld [vmem:[%s1302_s2 + $0x30] sm:$0xff]  ;;  %495 = vmatprep.mubr.f32.mxu0 %v1086_v15  ;;  %584 = vmatprep.mubr.f32.mxu1 %v1086_v15  ;;  %s169_s9 = scalar_lea.vmem %s1300_s0, %s891_s6  ;;  %s826_s6 = sshll.u32 %s164_s5, 4  ;;  %vm808_vm1 = vcmp.lt.s32.totalorder %v202_v16, 512  ;;  %s827_s6 = int_to_ptr.vmem [resolvable:$true] %s826_s6 }
  0x17   : > { %v625_v12 = vld [vmem:[%s1302_s2 + $0x40] sm:$0x1]  ;;  %v272_v18 = vsub.s32 1, %v1200_v17  ;;  %v276_v19 = vsub.s32 3, %v1200_v17  ;;  %v204_v20 = vsub.s32 0, %v1200_v17  ;;  %v280_v21 = vsub.s32 5, %v1200_v17  ;;  %p1029_p0 = scmp.lt.s32.totalorder %s827_s6, %s1027_s16 }
  0x18   : > { %v390_v14 = vld [vmem:[%s1302_s2 + $0x20] sm:$0xff]  ;;  %v208_v22 = vsub.s32 2, %v1200_v17  ;;  %v212_v23 = vsub.s32 4, %v1200_v17  ;;  %v284_v27 = vsub.s32 7, %v1200_v17  ;;  %v216_v28 = vsub.s32 6, %v1200_v17  ;;  %s1022_s11 = scalar_lea.vmem %s827_s6, 64 }
  0x19   : > { %953 = vset.pattern.permute.xlu1 %v1084_v2  ;;  %259 = vperm.xlu0 %951, %v178_v4   ;;  %v172_v25 = vld [vmem:[%s169_s9] sm:$0xff]  ;;  %s824_s9 = scalar_lea.hbm %s1303_s3, %s907_s4  ;;  %p1023_p11 = scmp.ne.s32.totalorder %s827_s6, %s1022_s11 }
  0x1a   : > { %263 = vperm.xlu1 %953, %v179_v1   ;;  %v273_v29 = vrot.slane %v172_v25, %v272_v18  ;;  %v277_v30 = vrot.slane %v172_v25, %v276_v19  ;;  %v205_v31 = vrot.slane %v172_v25, %v204_v20  ;;  %v281_v32 = vrot.slane %v172_v25, %v280_v21  ;;  %p1030_p1 = scmp.lt.s32.totalorder %s1028_s19, %s1022_s11 }
  0x1b   : > { %v209_v33 = vrot.slane %v172_v25, %v208_v22  ;;  %v213_v34 = vrot.slane %v172_v25, %v212_v23  ;;  %v285_v36 = vrot.slane %v172_v25, %v284_v27  ;;  %v217_v38 = vrot.slane %v172_v25, %v216_v28  ;;  %p1024_p12 = pnand %p1023_p11, %p1147_p5 }
  0x1c   : > { %v1213_v39 = vrot.slane %v273_v29, %v272_v18  ;;  %v1215_v40 = vrot.slane %v277_v30, %v272_v18  ;;  %v225_v41 = vrot.slane %v205_v31, %v204_v20  ;;  %v1217_v42 = vrot.slane %v281_v32, %v272_v18  ;;  %p1031_p2 = por %p1030_p1, %p1029_p0 }
  0x1d   : > { %955 = vset.pattern.permute.xlu0 %v1085_v3  ;;  %v229_v43 = vrot.slane %v209_v33, %v204_v20  ;;  %v233_v44 = vrot.slane %v213_v34, %v204_v20  ;;  %v305_v47 = vrot.slane %v285_v36, %v272_v18  ;;  %v237_v50 = vrot.slane %v217_v38, %v204_v20  ;;  %p1025_p13 = pneg %p1024_p12 }
  0x1e   : > { %954 = vset.pattern.permute.xlu1 %v1085_v3  ;;  %198 = vperm.xlu0 %955, %v180_v0  }
  0x1f   : > { %188 = vperm.xlu1 %954, %v178_v4   ;;  %p1032_p3 = pnand %p1031_p2, %p1025_p13 }
  0x22   : > { %183 = vperm.xlu0 %955, %v177_v5  }
  0x23   : > { %355 = vperm.xlu1 %954, %v176_v6  }
  0x26   : > { %345 = vperm.xlu0 %955, %v174_v7  }
  0x27   : > { %956 = vset.pattern.permute.xlu1 %v1084_v2 }
  0x28   : > { %255 = vperm.xlu1 %956, %v177_v5  }
  0x2a   : > { %415 = vperm.xlu0 %955, %v393_v8  }
  0x2c   : > { %957 = vset.pattern.permute.xlu1 %v1085_v3 }
  0x2d   : > { %350 = vperm.xlu1 %957, %v175_v9  }
  0x2e   : > { %405 = vperm.xlu0 %955, %v391_v10  }
  0x31   : > { %340 = vperm.xlu1 %957, %v173_v11  }
  0x32   : > { %629 = vperm.xlu0 %955, %v625_v12  }
  0x35   : > { %410 = vperm.xlu1 %957, %v392_v13  }
  0x39   : > { %400 = vperm.xlu1 %957, %v390_v14  }
  0x90   : > { %v194_v24 = vpop.permute.xlu1 %193  ;;  %v268_v26 = vpop.permute.xlu0 %267 }
  0x91   : > { %v318_v45 = vmul.f32 %v1213_v39, %v268_v26  ;;  %v319_v46 = vmul.f32 %v1215_v40, %v268_v26  ;;  %v320_v48 = vmul.f32 %v1217_v42, %v268_v26  ;;  %v321_v55 = vmul.f32 %v305_v47, %v268_v26 }
  0x92   : > { %v246_v1 = vmul.f32 %v225_v41, %v194_v24  ;;  %v247_v13 = vmul.f32 %v229_v43, %v194_v24  ;;  %v248_v21 = vmul.f32 %v233_v44, %v194_v24  ;;  %v249_v22 = vmul.f32 %v237_v50, %v194_v24 }
  0x94   : > { %v260_v35 = vpop.permute.xlu0 %259 }
  0x95   : > { %v264_v37 = vpop.permute.xlu1 %263  ;;  %v310_v56 = vmul.f32 %v1213_v39, %v260_v35  ;;  %v311_v61 = vmul.f32 %v1215_v40, %v260_v35  ;;  %v312_v2 = vmul.f32 %v1217_v42, %v260_v35  ;;  %v313_v3 = vmul.f32 %v305_v47, %v260_v35 }
  0x96   : > { %v314_v5 = vmul.f32 %v1213_v39, %v264_v37  ;;  %v315_v9 = vmul.f32 %v1215_v40, %v264_v37  ;;  %v316_v14 = vmul.f32 %v1217_v42, %v264_v37  ;;  %v317_v25 = vmul.f32 %v305_v47, %v264_v37 }
  0x98   : > { %v330_v30 = vadd.f32 %v314_v5, %v246_v1  ;;  %v331_v31 = vadd.f32 %v315_v9, %v247_v13  ;;  %v332_v35 = vadd.f32 %v316_v14, %v248_v21  ;;  %v397_v13 = vld [vmem:[%s1301_s1 + $0x38] sm:$0xff] }
  0x99   : > { %v199_v49 = vpop.permute.xlu0 %198 }
  0x9a   : > { %v250_v51 = vmul.f32 %v225_v41, %v199_v49  ;;  %v251_v52 = vmul.f32 %v229_v43, %v199_v49  ;;  %v252_v53 = vmul.f32 %v233_v44, %v199_v49  ;;  %v189_v54 = vpop.permute.xlu1 %188  ;;  %v253_v57 = vmul.f32 %v237_v50, %v199_v49 }
  0x9b   : > { %v242_v58 = vmul.f32 %v225_v41, %v189_v54  ;;  %v243_v62 = vmul.f32 %v229_v43, %v189_v54  ;;  %v244_v6 = vmul.f32 %v233_v44, %v189_v54  ;;  %v245_v10 = vmul.f32 %v237_v50, %v189_v54 }
  0x9c   : > { %v334_v59 = vadd.f32 %v318_v45, %v250_v51  ;;  %v335_v60 = vadd.f32 %v319_v46, %v251_v52  ;;  %v336_v0 = vadd.f32 %v320_v48, %v252_v53  ;;  %v337_v12 = vadd.f32 %v321_v55, %v253_v57 }
  0x9d   : > { %v184_v63 = vpop.permute.xlu0 %183  ;;  %v326_v11 = vadd.f32 %v310_v56, %v242_v58  ;;  %v327_v20 = vadd.f32 %v311_v61, %v243_v62  ;;  %v328_v26 = vadd.f32 %v312_v2, %v244_v6  ;;  %v329_v29 = vadd.f32 %v313_v3, %v245_v10 }
  0x9e   : > { %v356_v4 = vpop.permute.xlu1 %355  ;;  %v238_v33 = vmul.f32 %v225_v41, %v184_v63  ;;  %v239_v36 = vmul.f32 %v229_v43, %v184_v63  ;;  %v240_v38 = vmul.f32 %v233_v44, %v184_v63  ;;  %v241_v48 = vmul.f32 %v237_v50, %v184_v63 }
  0x9f   : > { %v370_v7 = vadd.f32 %v356_v4, %v334_v59  ;;  %v371_v8 = vadd.f32 %v356_v4, %v335_v60  ;;  %v372_v18 = vadd.f32 %v356_v4, %v336_v0  ;;  %v373_v32 = vadd.f32 %v356_v4, %v337_v12  ;;  %v396_v12 = vld [vmem:[%s1301_s1 + $0x30] sm:$0xff] }
  0xa0   : > { %v333_v52 = vadd.f32 %v317_v25, %v249_v22 }
  0xa1   : > { %v346_v19 = vpop.permute.xlu0 %345  ;;  %958 = vtanh.f32 %v370_v7 }
  0xa2   : > { %v362_v23 = vadd.f32 %v346_v19, %v326_v11  ;;  %v363_v27 = vadd.f32 %v346_v19, %v327_v20  ;;  %960 = vtanh.f32 %v371_v8  ;;  %v364_v34 = vadd.f32 %v346_v19, %v328_v26  ;;  %v394_v8 = vld [vmem:[%s1301_s1 + $0x20] sm:$0xff]  ;;  %v395_v11 = vld [vmem:[%s1301_s1 + $0x28] sm:$0xff] }
  0xa3   : > { %v256_v28 = vpop.permute.xlu1 %255  ;;  %962 = vtanh.f32 %v372_v18  ;;  %v365_v45 = vadd.f32 %v346_v19, %v329_v29 }
  0xa4   : > { %964 = vtanh.f32 %v362_v23  ;;  %v306_v24 = vmul.f32 %v1213_v39, %v256_v28  ;;  %v307_v37 = vmul.f32 %v1215_v40, %v256_v28  ;;  %v308_v46 = vmul.f32 %v1217_v42, %v256_v28 }
  0xa5   : > { %966 = vtanh.f32 %v363_v27  ;;  %v309_v49 = vmul.f32 %v305_v47, %v256_v28  ;;  %v416_v19 = vpop.permute.xlu0 %415 }
  0xa6   : > { %968 = vtanh.f32 %v373_v32  ;;  %v322_v44 = vadd.f32 %v306_v24, %v238_v33  ;;  %v323_v55 = vadd.f32 %v307_v37, %v239_v36  ;;  %v324_v56 = vadd.f32 %v308_v46, %v240_v38 }
  0xa7   : > { %970 = vtanh.f32 %v364_v34  ;;  %v325_v40 = vadd.f32 %v309_v49, %v241_v48 }
  0xa8   : > { %v351_v51 = vpop.permute.xlu1 %350  ;;  %972 = vtanh.f32 %v365_v45 }
  0xa9   : > { %v366_v41 = vadd.f32 %v351_v51, %v330_v30  ;;  %v367_v53 = vadd.f32 %v351_v51, %v331_v31  ;;  %v368_v54 = vadd.f32 %v351_v51, %v332_v35  ;;  %v369_v43 = vadd.f32 %v351_v51, %v333_v52  ;;  %v406_v28 = vpop.permute.xlu0 %405 }
  0xab   : > { %974 = vtanh.f32 %v366_v41 }
  0xac   : > { %976 = vtanh.f32 %v367_v53  ;;  %v341_v39 = vpop.permute.xlu1 %340 }
  0xad   : > { %978 = vtanh.f32 %v368_v54  ;;  %v358_v42 = vadd.f32 %v341_v39, %v322_v44  ;;  %v359_v50 = vadd.f32 %v341_v39, %v323_v55  ;;  %v360_v47 = vadd.f32 %v341_v39, %v324_v56 }
  0xae   : > { %980 = vtanh.f32 %v369_v43  ;;  %v361_v57 = vadd.f32 %v341_v39, %v325_v40  ;;  %v959_v58 = vpop.eup %958 }
  0xaf   : > { %982 = vtanh.f32 %v358_v42  ;;  %v961_v59 = vpop.eup %960 }
  0xb0   : > { %984 = vtanh.f32 %v359_v50  ;;  %455 = vmatprep.subr.mxu0 %v961_v59  ;;  %v963_v60 = vpop.eup %962  ;;  %v411_v14 = vpop.permute.xlu1 %410 }
  0xb1   : > { %986 = vtanh.f32 %v360_v47  ;;  %456 = vmatpush1.msra.mxu0 %v959_v58  ;;  %v965_v61 = vpop.eup %964 }
  0xb2   : > { %988 = vtanh.f32 %v361_v57  ;;  %v967_v62 = vpop.eup %966 }
  0xb3   : > { %v969_v63 = vpop.eup %968 }
  0xb4   : > { %v971_v0 = vpop.eup %970  ;;  %544 = vmatprep.subr.mxu1 %v969_v63  ;;  %v401_v25 = vpop.permute.xlu1 %400 }
  0xb5   : > { %v973_v1 = vpop.eup %972  ;;  %545 = vmatpush1.msra.mxu1 %v963_v60 }
  0xb8   : > { %v975_v2 = vpop.eup %974 }
  0xb9   : > { %v977_v3 = vpop.eup %976 }
  0xba   : > { %v979_v4 = vpop.eup %978  ;;  %457 = vmatprep.subr.mxu0 %v977_v3 }
  0xbb   : > { %v981_v5 = vpop.eup %980  ;;  %458 = vmatpush1.msra.mxu0 %v975_v2  ;;  %v626_v2 = vld [vmem:[%s1301_s1 + $0x40] sm:$0x1] }
  0xbc   : > { %v983_v6 = vpop.eup %982  ;;  %546 = vmatprep.subr.mxu1 %v981_v5  ;;  %459 = vmatprep.subr.mxu0 %v967_v62  ;;  %v1087_v5 = vmov 1966171168  }
  0xbd   : > { %v985_v7 = vpop.eup %984  ;;  %547 = vmatpush1.msra.mxu1 %v979_v4  ;;  %460 = vmatpush1.msra.mxu0 %v965_v61 }
  0xbe   : > { %v987_v9 = vpop.eup %986  ;;  %548 = vmatprep.subr.mxu1 %v973_v1  ;;  %461 = vmatprep.subr.mxu0 %v985_v7 }
  0xbf   : > { %v989_v10 = vpop.eup %988  ;;  %549 = vmatpush1.msra.mxu1 %v971_v0  ;;  %462 = vmatpush1.msra.mxu0 %v983_v6  ;;  %v784_v6 = vunpack.c.l.s4 %v1087_v5 }
  0xc0   : > { %550 = vmatprep.subr.mxu1 %v989_v10  ;;  %892 = vmatmul.mubr.msk.f32.vlgmr.msra.gmra.mxu0 %vm418_vm0, %v394_v8  ;;  %v630_v10 = vpop.permute.xlu0 %629 }
  0xc1   : > { %551 = vmatpush1.msra.mxu1 %v987_v9  ;;  %501 = vmatprep.mubr.f32.mxu0 %v1086_v15  ;;  %v785_v7 = vunpack.c.0.s8 %v784_v6 }
  0xc2   : > { %896 = vmatmul.mubr.msk.f32.vlgmr.msra.gmra.mxu1 %vm418_vm0, %v394_v8 }
  0xc3   : > { %590 = vmatprep.mubr.f32.mxu1 %v1086_v15 }
  0xc4   : > { %893 = vmatmul.mubr.msk.f32.gmra.mxu0 %vm418_vm0, %v395_v11 }
  0xc5   : > { %507 = vmatprep.mubr.f32.mxu0 %v1086_v15 }
  0xc6   : > { %897 = vmatmul.mubr.msk.f32.gmra.mxu1 %vm418_vm0, %v395_v11 }
  0xc7   : > { %596 = vmatprep.mubr.f32.mxu1 %v1086_v15 }
  0xc8   : > { %894 = vmatmul.mubr.msk.f32.gmra.mxu0 %vm418_vm0, %v396_v12 }
  0xc9   : > { %513 = vmatprep.mubr.f32.mxu0 %v1086_v15 }
  0xca   : > { %898 = vmatmul.mubr.msk.f32.gmra.mxu1 %vm418_vm0, %v396_v12 }
  0xcb   : > { %602 = vmatprep.mubr.f32.mxu1 %v1086_v15 }
  0xcc   : > { %895 = vmatmul.mubr.msk.f32.gmra.mxu0 %vm418_vm0, %v397_v13 }
  0xcd   : > { %699 = vmatprep.mubr.f32.mxu0 %v1086_v15 }
  0xce   : > { %899 = vmatmul.mubr.msk.f32.gmra.mxu1 %vm418_vm0, %v397_v13 }
  0xcf   : > { %770 = vmatprep.mubr.f32.mxu1 %v1086_v15 }
 0x180   : > { %v497_v18 = vpop.f32.mrf.mxu0 }
 0x181   : > { %v498_v29 = vadd.f32 %v497_v18, %v401_v25 }
 0x182   : > { %v586_v20 = vpop.f32.mrf.mxu1  ;;  %v499_v21 = vpop.f32.mrf.mxu0 }
 0x183   : > { %v500_v30 = vadd.f32 %v499_v21, %v401_v25  ;;  %990 = vtanh.f32 %v498_v29  ;;  %v587_v56 = vadd.f32 %v586_v20, %v401_v25 }
 0x184   : > { %v588_v22 = vpop.f32.mrf.mxu1  ;;  %v503_v23 = vpop.f32.mrf.mxu0 }
 0x185   : > { %v504_v33 = vadd.f32 %v503_v23, %v406_v28  ;;  %992 = vtanh.f32 %v500_v30  ;;  %v589_v55 = vadd.f32 %v588_v22, %v401_v25 }
 0x186   : > { %v592_v26 = vpop.f32.mrf.mxu1  ;;  %v505_v27 = vpop.f32.mrf.mxu0 }
 0x187   : > { %v506_v34 = vadd.f32 %v505_v27, %v406_v28  ;;  %994 = vtanh.f32 %v504_v33  ;;  %v593_v44 = vadd.f32 %v592_v26, %v406_v28 }
 0x188   : > { %v594_v31 = vpop.f32.mrf.mxu1  ;;  %v509_v32 = vpop.f32.mrf.mxu0 }
 0x189   : > { %v510_v15 = vadd.f32 %v509_v32, %v411_v14  ;;  %996 = vtanh.f32 %v506_v34  ;;  %v595_v43 = vadd.f32 %v594_v31, %v406_v28 }
 0x18a   : > { %v598_v35 = vpop.f32.mrf.mxu1  ;;  %v511_v36 = vpop.f32.mrf.mxu0 }
 0x18b   : > { %v512_v38 = vadd.f32 %v511_v36, %v411_v14  ;;  %998 = vtanh.f32 %v510_v15  ;;  %v599_v54 = vadd.f32 %v598_v35, %v411_v14 }
 0x18c   : > { %v600_v45 = vpop.f32.mrf.mxu1  ;;  %v515_v24 = vpop.f32.mrf.mxu0 }
 0x18d   : > { %v516_v37 = vadd.f32 %v515_v24, %v416_v19  ;;  %1000 = vtanh.f32 %v512_v38  ;;  %v601_v41 = vadd.f32 %v600_v45, %v411_v14  ;;  %v788_v14 = vsub.s32 %v785_v7, %v1200_v17 }
 0x18e   : > { %v604_v46 = vpop.f32.mrf.mxu1  ;;  %v517_v48 = vpop.f32.mrf.mxu0 }
 0x18f   : > { %v518_v49 = vadd.f32 %v517_v48, %v416_v19  ;;  %v605_v51 = vadd.f32 %v604_v46, %v416_v19  ;;  %1002 = vtanh.f32 %v516_v37 }
 0x190   : > { %v606_v52 = vpop.f32.mrf.mxu1  ;;  %v991_v39 = vpop.eup %990 }
 0x191   : > { %v607_v53 = vadd.f32 %v606_v52, %v416_v19  ;;  %1004 = vtanh.f32 %v518_v49 }
 0x192   : > { %v993_v40 = vpop.eup %992 }
 0x193   : > { %1006 = vtanh.f32 %v607_v53 }
 0x194   : > { %1008 = vtanh.f32 %v605_v51  ;;  %v995_v42 = vpop.eup %994 }
 0x195   : > { %1010 = vtanh.f32 %v601_v41 }
 0x196   : > { %1012 = vtanh.f32 %v599_v54  ;;  %v997_v50 = vpop.eup %996 }
 0x197   : > { %1014 = vtanh.f32 %v595_v43 }
 0x198   : > { %1016 = vtanh.f32 %v593_v44  ;;  %v999_v47 = vpop.eup %998 }
 0x199   : > { %1018 = vtanh.f32 %v589_v55 }
 0x19a   : > { %1020 = vtanh.f32 %v587_v56  ;;  %v1001_v57 = vpop.eup %1000 }
 0x19c   : > { %v1003_v58 = vpop.eup %1002 }
 0x19e   : > { %v1005_v59 = vpop.eup %1004 }
 0x19f   : > { %659 = vmatprep.subr.mxu0 %v1005_v59 }
 0x1a0   : > { %v1007_v60 = vpop.eup %1006  ;;  %660 = vmatpush1.msra.mxu0 %v1003_v58 }
 0x1a1   : > { %v1009_v61 = vpop.eup %1008  ;;  %730 = vmatprep.subr.mxu1 %v1007_v60  ;;  %661 = vmatprep.subr.mxu0 %v1001_v57 }
 0x1a2   : > { %v1011_v62 = vpop.eup %1010  ;;  %731 = vmatpush1.msra.mxu1 %v1009_v61  ;;  %662 = vmatpush1.msra.mxu0 %v999_v47 }
 0x1a3   : > { %v1013_v63 = vpop.eup %1012  ;;  %732 = vmatprep.subr.mxu1 %v1011_v62  ;;  %663 = vmatprep.subr.mxu0 %v997_v50 }
 0x1a4   : > { %v1015_v0 = vpop.eup %1014  ;;  %733 = vmatpush1.msra.mxu1 %v1013_v63  ;;  %664 = vmatpush1.msra.mxu0 %v995_v42 }
 0x1a5   : > { %v1017_v1 = vpop.eup %1016  ;;  %734 = vmatprep.subr.mxu1 %v1015_v0  ;;  %665 = vmatprep.subr.mxu0 %v993_v40 }
 0x1a6   : > { %v1019_v3 = vpop.eup %1018  ;;  %735 = vmatpush1.msra.mxu1 %v1017_v1  ;;  %666 = vmatpush1.msra.mxu0 %v991_v39 }
 0x1a7   : > { %v1021_v4 = vpop.eup %1020  ;;  %736 = vmatprep.subr.mxu1 %v1019_v3  ;;  %900 = vmatmul.mubr.msk.f32.vlgmr.msra.gmra.mxu0 %vm418_vm0, %v626_v2 }
 0x1a8   : > { %737 = vmatpush1.msra.mxu1 %v1021_v4 }
 0x1a9   : > { %901 = vmatmul.mubr.msk.f32.vlgmr.msra.gmra.mxu1 %vm418_vm0, %v626_v2 }
 0x267   : > { %v701_v8 = vpop.f32.mrf.mxu0 }
 0x268   : > { %v702_v12 = vadd.f32 %v701_v8, %v630_v10 }
 0x269   : > { %v772_v9 = vpop.f32.mrf.mxu1  ;;  %v703_v11 = vpop.f32.mrf.mxu0 }
 0x26a   : > { %v704_v13 = vadd.f32 %v703_v11, %v630_v10  ;;  %v773_v19 = vadd.f32 %v772_v9, %v630_v10 }
 0x26b   : > { %v774_v18 = vpop.f32.mrf.mxu1 }
 0x26c   : > { %v775_v20 = vadd.f32 %v774_v18, %v630_v10  ;;  %v781_v21 = vcombine.low %v702_v12, %v704_v13 }
 0x26e   : > { %v782_v22 = vcombine.low %v773_v19, %v775_v20  ;;  %v789_v23 = vrot.slane %v781_v21, %v788_v14 }
 0x270   : > { %v796_v25 = vrot.slane %v782_v22, %v788_v14 }
 0x272   : > { %v797_v26 = vcombine.low %v789_v23, %v796_v25 }
 0x274   : > { %v804_v27 = vrot.slane %v797_v26, %v788_v14 }
 0x276   : > { %810 = vst.msk [vmem:[%s164_s5] sm:$0xf] %vm808_vm1, %v804_v27 }
 0x277   : > { %1035 = shalt.err (!%p1032_p3)
}
 0x278   : > { %s1036_s20 = scalar_lea.hbm %s824_s9, 64  ;;  %s1040_s26 = scalar_lea.hbm %s1303_s3, 128 }
 0x279   : > { %p1037_p4 = scmp.ne.s32.totalorder %s824_s9, %s1036_s20  ;;  %p1041_p9 = scmp.lt.s32.totalorder %s824_s9, %s1303_s3 }
 0x27a   : > { %p1042_p10 = scmp.lt.s32.totalorder %s1040_s26, %s1036_s20 }
 0x27b   : > { %p1038_p7 = pnand %p1037_p4, %p1147_p5 }
 0x27c   : > { %p1043_p11 = por %p1042_p10, %p1041_p9 }
 0x27d   : > { %p1039_p8 = pneg %p1038_p7 }
 0x27f   : > { %p1044_p12 = pnand %p1043_p11, %p1039_p8 }
 0x281   : > { %1047 = shalt.err (!%p1044_p12)
}
 0x282   : > { %908 = dma.vmem_to_hbm [thread:$0]  (%p1147_p5), %s827_s6, 64, %s824_s9, %s812_s10  }
 0x283 PF: > { %p914_p13 = scmp.ge.s32.totalorder %s1082_s15, 2  ;;  %s838_s29 = sand.u32 1, %s1070_s12  }
 0x284   : > { %s839_s30 = scalar_lea.sflag [#allocation3], %s838_s29 }
 0x285   : > { %p911_p0 = pnand %p914_p13, %p1151_p6 }
 0x287   : > { %p912_p1 = pneg %p911_p0 }
 0x289   : > { %1065 = dma.done.wait (%p912_p1), %s839_s30, 64  }
 0x28a   : > { %1067 = vsyncadd (%p912_p1), %s839_s30, 4294967232  ;;  %p13_p2 = scmp.ge.s32.totalorder %s1134_s18, 4   ;;  %s1306_s12 = smov %s1074_s13 }
 0x28b   : > { %s1307_s13 = smov %s1078_s14  ;;  %s1308_s14 = smov %s1145_s21 }
 0x28c   : > { %s1309_s15 = smov %s1134_s18  ;;  %15 = sbr.rel (!%p13_p2) target bundleno = 3 (0x3), region = 67 }
 0x291   :  { %844 = vsyncpa [#allocation3], 1 }
 0x292   :  { %846 = vsyncpa [#allocation3 + $0x1], 1 }

</bundles_post_ra>
